<compile_context>
chip_gen: v5e
topology: v5e:2x2
jax: 0.10.0
libtpu: 0.0.40
codegen_flags: <defaults>
</compile_context>

<pallas_src>
import math

import jax
import jax.numpy as jnp
from jax.experimental import pallas as pl
from jax.experimental.pallas import tpu as pltpu


def _round_up(x: int, m: int) -> int:
    return ((x + m - 1) // m) * m


def _fused_kernel(coords_ref, kparams_ref, w_ref, peb_ref, out_ref):
    """Fused: per-key MVN log-probs -> Linear(n_keys->dim) -> + (pos-enc + bias).

    coords_ref : (2, T)      rows = [x, y], points on lanes
    kparams_ref: (K, 8)      cols = [mu0, mu1, inv00, inv01, inv11, const, mask, 0]
    w_ref      : (D_pad, K)  Linear weight, rows zero-padded to a multiple of 8
    peb_ref    : (D_pad, T)  positional encoding + bias, per point
    out_ref    : (D_pad, T)
    """
    x0 = coords_ref[0:1, :]                              # (1, T) lane-dense
    x1 = coords_ref[1:2, :]                              # (1, T)

    kp = kparams_ref[...]                                # (K, 8)
    mu0, mu1 = kp[:, 0:1], kp[:, 1:2]                    # (K, 1)
    i00, i01, i11 = kp[:, 2:3], kp[:, 3:4], kp[:, 4:5]
    cst, msk = kp[:, 5:6], kp[:, 6:7]

    dx = x0 - mu0                                        # (K, T)
    dy = x1 - mu1
    quad = dx * dx * i00 + 2.0 * (dx * dy) * i01 + dy * dy * i11
    wts = (cst - 0.5 * quad) * msk                       # (K, T) key log-prob weights (VPU)

    # The module's genuine nn.Linear(n_keys, dim): emb = W @ wts  (MXU).
    emb = jnp.dot(w_ref[...], wts, preferred_element_type=jnp.float32)   # (D_pad, T)
    out_ref[...] = emb + peb_ref[...]


def _pack_key_params(means, mats, present_mask):
    """Per-key slab (K, 8): [mu0, mu1, inv00, inv01, inv11, const, mask, pad]."""
    covs = jnp.einsum("kij,klj->kil", mats, mats)        # Sigma_k = A_k A_k^T
    c00, c01, c11 = covs[:, 0, 0], covs[:, 0, 1], covs[:, 1, 1]
    det = c00 * c11 - c01 * c01
    inv00, inv01, inv11 = c11 / det, -c01 / det, c00 / det
    const = -0.5 * jnp.log(det) - math.log(2.0 * math.pi)    # d=2 -> -log(2*pi)
    mask = present_mask.astype(jnp.float32)
    pad = jnp.zeros_like(mask)
    return jnp.stack(
        [means[:, 0], means[:, 1], inv00, inv01, inv11, const, mask, pad], axis=1
    ).astype(jnp.float32)                                # (K, 8)


def make_positional_encoding(d_model: int, max_len: int):
    """Mirror of PositionalEncoding's buffer, as a (max_len, d_model) table."""
    position = jnp.arange(max_len, dtype=jnp.float32)[:, None]
    div_term = jnp.exp(jnp.arange(0, d_model, 2, dtype=jnp.float32)
                       * (-math.log(10000.0) / d_model))
    pe = jnp.zeros((max_len, d_model), jnp.float32)
    pe = pe.at[:, 0::2].set(jnp.sin(position * div_term))
    if d_model % 2 == 0:
        pe = pe.at[:, 1::2].set(jnp.cos(position * div_term))
    else:
        pe = pe.at[:, 1::2].set(jnp.cos(position * div_term[:-1]))
    return pe


@jax.jit
def separate_traj_embedding_forward(traj_feats, coords, means, mats, present_mask,
                                    emb_w, emb_b, pe_table):
    """traj_feats: (seq, batch, F), coords: (seq, batch, 2) -> (seq, batch, F + D)."""
    seq, batch = coords.shape[0], coords.shape[1]
    n = seq * batch
    n_keys = means.shape[0]
    d_model = emb_w.shape[0]
    d_pad = _round_up(d_model, 8)

    tile_n = min(512, _round_up(n, 128))                 # lane-dense, amortizes grid overhead
    n_pad = _round_up(n, tile_n)

    # Points on the lane axis: coords fed transposed as (2, N_pad).
    coords_t = coords.reshape(n, 2).astype(jnp.float32).T            # (2, n)
    coords_t = jnp.pad(coords_t, ((0, 0), (0, n_pad - n)))

    kparams = _pack_key_params(means, mats, present_mask)            # (K, 8)

    w_pad = jnp.pad(emb_w.astype(jnp.float32),
                    ((0, d_pad - d_model), (0, 0)))                  # (D_pad, K)

    # (pos-encoding + bias) per point; flatten order of coords is (seq, batch),
    # so point n has seq index n // batch  ->  repeat each column `batch` times.
    peb = (pe_table[:seq].astype(jnp.float32) + emb_b.astype(jnp.float32)).T   # (D, seq)
    peb = jnp.repeat(peb, batch, axis=1)                                       # (D, n)
    peb = jnp.pad(peb, ((0, d_pad - d_model), (0, n_pad - n)))                 # (D_pad, n_pad)

    out = pl.pallas_call(
        _fused_kernel,
        out_shape=jax.ShapeDtypeStruct((d_pad, n_pad), jnp.float32),
        grid_spec=pltpu.PrefetchScalarGridSpec(
            num_scalar_prefetch=0,
            grid=(n_pad // tile_n,),
            in_specs=[
                pl.BlockSpec((2, tile_n), lambda i: (0, i)),         # coords (lane-dense)
                pl.BlockSpec((n_keys, 8), lambda i: (0, 0)),         # key params (resident)
                pl.BlockSpec((d_pad, n_keys), lambda i: (0, 0)),     # Linear weight (resident)
                pl.BlockSpec((d_pad, tile_n), lambda i: (0, i)),     # pos-enc + bias
            ],
            out_specs=pl.BlockSpec((d_pad, tile_n), lambda i: (0, i)),
        ),
        compiler_params=pltpu.CompilerParams(
            dimension_semantics=("parallel",),
        ),
    )(coords_t, kparams, w_pad, peb)

    kb_emb = out[:d_model, :n].T.reshape(seq, batch, d_model)
    # TODO(synk): dropout layers run in eval mode (identity); training-mode dropout not implemented.
    return jnp.concatenate([traj_feats.astype(jnp.float32), kb_emb], axis=-1)


def _reference_forward(traj_feats, coords, means, mats, present_mask,
                       emb_w, emb_b, pe_table):
    """Plain-JAX reference mirroring the PyTorch module (eval mode)."""
    covs = jnp.einsum("kij,klj->kil", mats, mats)
    d = coords[..., None, :] - means                      # (..., K, 2)
    inv = jnp.linalg.inv(covs)                            # (K, 2, 2)
    quad = jnp.einsum("...ki,kij,...kj->...k", d, inv, d)
    logp = -0.5 * quad - 0.5 * jnp.log(jnp.linalg.det(covs)) - math.log(2.0 * math.pi)
    weights = jnp.where(present_mask, logp, 0.0)          # (seq, batch, K)
    emb = weights @ emb_w.T + emb_b                       # (seq, batch, D)
    emb = emb + pe_table[: coords.shape[0]][:, None, :]   # positional encoding
    return jnp.concatenate([traj_feats, emb], axis=-1)


if __name__ == "__main__":
    key = jax.random.PRNGKey(0)
    kc, km, kx, kt, kw, kb = jax.random.split(key, 6)

    n_keys = 8
    key_emb_size = 32
    seq_len, batch_size = 16, 2
    traj_dim = 6
    max_len = 64

    # Key centers; mark key 3 as "unpresent" (-1, -1).
    key_centers = jax.random.normal(kc, (n_keys, 2), dtype=jnp.float32)
    key_centers = key_centers.at[3].set(jnp.array([-1.0, -1.0], jnp.float32))
    present_mask = ~jnp.logical_and(key_centers[:, 0] == -1.0,
                                    key_centers[:, 1] == -1.0)

    means = key_centers                                   # trainable means init = centers
    mats = jax.random.normal(km, (n_keys, 2, 2), dtype=jnp.float32)   # PSD factors A_k

    emb_w = jax.random.normal(kw, (key_emb_size, n_keys), dtype=jnp.float32) / math.sqrt(n_keys)
    emb_b = jax.random.normal(kb, (key_emb_size,), dtype=jnp.float32) * 0.1

    coords = jax.random.normal(kx, (seq_len, batch_size, 2), dtype=jnp.float32)
    traj_feats = jax.random.normal(kt, (seq_len, batch_size, traj_dim), dtype=jnp.float32)

    pe_table = make_positional_encoding(key_emb_size, max_len)

    out = separate_traj_embedding_forward(
        traj_feats, coords, means, mats, present_mask, emb_w, emb_b, pe_table)
    out = jax.block_until_ready(out)

    ref = _reference_forward(
        traj_feats, coords, means, mats, present_mask, emb_w, emb_b, pe_table)

    assert out.shape == (seq_len, batch_size, traj_dim + key_emb_size), out.shape
    max_err = float(jnp.max(jnp.abs(out - ref)))
    assert jnp.allclose(out, ref, rtol=1e-3, atol=1e-3), max_err

    print("KERNEL_OK")
</pallas_src>

<mosaic_0001>
module attributes {stable_mosaic.version = 11 : i64} {
  func.func @_fused_kernel(%arg0: i32, %arg1: memref<2x128xf32, #tpu.memory_space<vmem>>, %arg2: memref<8x8xf32, #tpu.memory_space<vmem>>, %arg3: memref<32x8xf32, #tpu.memory_space<vmem>>, %arg4: memref<32x128xf32, #tpu.memory_space<vmem>>, %arg5: memref<32x128xf32, #tpu.memory_space<vmem>>) attributes {dimension_semantics = [#tpu.dimension_semantics<parallel>], iteration_bounds = array<i64: 1>, scalar_prefetch = 0 : i64, scratch_operands = 0 : i64, tpu.core_type = #tpu.core_type<tc>, window_params = [{transform_indices = @transform_0, window_bounds = array<i64: 2, 128>}, {pipeline_mode = #tpu.pipeline_mode<synchronous>, transform_indices = @transform_1, window_bounds = array<i64: 8, 8>}, {pipeline_mode = #tpu.pipeline_mode<synchronous>, transform_indices = @transform_2, window_bounds = array<i64: 32, 8>}, {transform_indices = @transform_3, window_bounds = array<i64: 32, 128>}, {transform_indices = @transform_4, window_bounds = array<i64: 32, 128>}]} {
    %c0 = arith.constant 0 : index
    %c0_0 = arith.constant 0 : index
    %0 = vector.load %arg1[%c0, %c0_0] : memref<2x128xf32, #tpu.memory_space<vmem>>, vector<1x128xf32>
    %c1 = arith.constant 1 : index
    %c0_1 = arith.constant 0 : index
    %1 = vector.load %arg1[%c1, %c0_1] : memref<2x128xf32, #tpu.memory_space<vmem>>, vector<1x128xf32>
    %c0_2 = arith.constant 0 : index
    %c0_3 = arith.constant 0 : index
    %2 = vector.load %arg2[%c0_2, %c0_3] : memref<8x8xf32, #tpu.memory_space<vmem>>, vector<8x8xf32>
    %3 = vector.extract_strided_slice %2 {offsets = [0, 0], sizes = [8, 1], strides = [1, 1]} : vector<8x8xf32> to vector<8x1xf32>
    %4 = vector.extract_strided_slice %2 {offsets = [0, 1], sizes = [8, 1], strides = [1, 1]} : vector<8x8xf32> to vector<8x1xf32>
    %5 = vector.extract_strided_slice %2 {offsets = [0, 2], sizes = [8, 1], strides = [1, 1]} : vector<8x8xf32> to vector<8x1xf32>
    %6 = vector.extract_strided_slice %2 {offsets = [0, 3], sizes = [8, 1], strides = [1, 1]} : vector<8x8xf32> to vector<8x1xf32>
    %7 = vector.extract_strided_slice %2 {offsets = [0, 4], sizes = [8, 1], strides = [1, 1]} : vector<8x8xf32> to vector<8x1xf32>
    %8 = vector.extract_strided_slice %2 {offsets = [0, 5], sizes = [8, 1], strides = [1, 1]} : vector<8x8xf32> to vector<8x1xf32>
    %9 = vector.extract_strided_slice %2 {offsets = [0, 6], sizes = [8, 1], strides = [1, 1]} : vector<8x8xf32> to vector<8x1xf32>
    %10 = vector.broadcast %0 : vector<1x128xf32> to vector<8x128xf32>
    %11 = vector.broadcast %3 : vector<8x1xf32> to vector<8x128xf32>
    %12 = arith.subf %10, %11 : vector<8x128xf32>
    %13 = vector.broadcast %1 : vector<1x128xf32> to vector<8x128xf32>
    %14 = vector.broadcast %4 : vector<8x1xf32> to vector<8x128xf32>
    %15 = arith.subf %13, %14 : vector<8x128xf32>
    %16 = arith.mulf %12, %12 : vector<8x128xf32>
    %17 = vector.broadcast %5 : vector<8x1xf32> to vector<8x128xf32>
    %18 = arith.mulf %16, %17 : vector<8x128xf32>
    %19 = arith.mulf %12, %15 : vector<8x128xf32>
    %cst = arith.constant 2.000000e+00 : f32
    %20 = vector.broadcast %cst : f32 to vector<8x128xf32>
    %21 = arith.mulf %20, %19 : vector<8x128xf32>
    %22 = vector.broadcast %6 : vector<8x1xf32> to vector<8x128xf32>
    %23 = arith.mulf %21, %22 : vector<8x128xf32>
    %24 = arith.addf %18, %23 : vector<8x128xf32>
    %25 = arith.mulf %15, %15 : vector<8x128xf32>
    %26 = vector.broadcast %7 : vector<8x1xf32> to vector<8x128xf32>
    %27 = arith.mulf %25, %26 : vector<8x128xf32>
    %28 = arith.addf %24, %27 : vector<8x128xf32>
    %cst_4 = arith.constant 5.000000e-01 : f32
    %29 = vector.broadcast %cst_4 : f32 to vector<8x128xf32>
    %30 = arith.mulf %29, %28 : vector<8x128xf32>
    %31 = vector.broadcast %8 : vector<8x1xf32> to vector<8x128xf32>
    %32 = arith.subf %31, %30 : vector<8x128xf32>
    %33 = vector.broadcast %9 : vector<8x1xf32> to vector<8x128xf32>
    %34 = arith.mulf %32, %33 : vector<8x128xf32>
    %c0_5 = arith.constant 0 : index
    %c0_6 = arith.constant 0 : index
    %35 = vector.load %arg3[%c0_5, %c0_6] : memref<32x8xf32, #tpu.memory_space<vmem>>, vector<32x8xf32>
    %cst_7 = arith.constant dense<0.000000e+00> : vector<32x128xf32>
    %36 = tpu.matmul %35, %34, %cst_7 {dimension_numbers = #tpu.dot_dimension_numbers<[1], [0], [0], [1], [0, 0, 1, 1], [], []>} : vector<32x8xf32>, vector<8x128xf32>, vector<32x128xf32> -> vector<32x128xf32>
    %c0_8 = arith.constant 0 : index
    %c0_9 = arith.constant 0 : index
    %37 = vector.load %arg4[%c0_8, %c0_9] : memref<32x128xf32, #tpu.memory_space<vmem>>, vector<32x128xf32>
    %38 = arith.addf %36, %37 : vector<32x128xf32>
    %c0_10 = arith.constant 0 : index
    %c0_11 = arith.constant 0 : index
    %39 = vector.load %arg5[%c0_10, %c0_11] : memref<32x128xf32, #tpu.memory_space<vmem>>, vector<32x128xf32>
    tpu.vector_store %arg5[%c0_10, %c0_11], %38 {strides = array<i32>} : memref<32x128xf32, #tpu.memory_space<vmem>>, vector<32x128xf32>,
    return
  }
  func.func @transform_0(%arg0: i32) -> (i32, i32) {
    %c0_i32 = arith.constant 0 : i32
    %c0_i32_0 = arith.constant 0 : i32
    return %c0_i32, %arg0 : i32, i32
  }
  func.func @transform_1(%arg0: i32) -> (i32, i32) {
    %c0_i32 = arith.constant 0 : i32
    %c0_i32_0 = arith.constant 0 : i32
    %c0_i32_1 = arith.constant 0 : i32
    return %c0_i32, %c0_i32_0 : i32, i32
  }
  func.func @transform_2(%arg0: i32) -> (i32, i32) {
    %c0_i32 = arith.constant 0 : i32
    %c0_i32_0 = arith.constant 0 : i32
    %c0_i32_1 = arith.constant 0 : i32
    return %c0_i32, %c0_i32_0 : i32, i32
  }
  func.func @transform_3(%arg0: i32) -> (i32, i32) {
    %c0_i32 = arith.constant 0 : i32
    %c0_i32_0 = arith.constant 0 : i32
    return %c0_i32, %arg0 : i32, i32
  }
  func.func @transform_4(%arg0: i32) -> (i32, i32) {
    %c0_i32 = arith.constant 0 : i32
    %c0_i32_0 = arith.constant 0 : i32
    return %c0_i32, %arg0 : i32, i32
  }
}

</mosaic_0001>

<bundles_post_ra>
// kernel: separate_traj_embedding_forward.1
= control target key start
LH: loop header
LB: loop body
LE: loop exit
PB: predicated region body
PF: predicated region fallthrough
CT: control target
= control target key end

     0   :  { %v147_v0 = vmov 0   ;;  %v148_v2 = vmov 2   ;;  %v149_v3 = vmov 4   ;;  %v150_v4 = vmov 1   ;;  %s224_s1 = inlined_call_operand.vmem [shape: f32[8,8], index: 1, kind: input, shape index: {}]   ;;  %s225_s0 = inlined_call_operand.vmem [shape: f32[2,128], index: 0, kind: input, shape index: {}]   ;;  %s226_s2 = inlined_call_operand.vmem [shape: f32[32,8], index: 2, kind: input, shape index: {}]   ;;  %s227_s3 = inlined_call_operand.vmem [shape: f32[32,128], index: 3, kind: input, shape index: {}]   ;;  %s228_s4 = inlined_call_operand.vmem [shape: f32[32,128], index: 4, kind: output, shape index: {}]  }
   0x1   :  { %137 = vset.pattern.permute.xlu0 %v147_v0  ;;  %v19_v1 = vld [vmem:[%s224_s1] sm:$0xff]  ;;  %139 = vset.pattern.permute.xlu1 %v148_v2  ;;  %v151_v5 = vmov 3   ;;  %v152_v6 = vmov 5   ;;  %v153_v7 = vmov 6   ;;  %v67_v31 = vld [vmem:[%s226_s2 + $0x10] sm:$0xff]  ;;  %vm73_vm0 = vcmask 64512  }
   0x2   :  { %23 = vperm.xlu0 %137, %v19_v1   ;;  %35 = vperm.xlu1 %139, %v19_v1   ;;  %v145_v9 = vld [vmem:[%s225_s0] ss:$0 sm:$0xff]  ;;  %v146_v11 = vld [vmem:[%s225_s0 + $0x1] ss:$0 sm:$0xff]  ;;  %v68_v32 = vld [vmem:[%s226_s2 + $0x18] sm:$0xff] }
   0x3   :  { %141 = vset.pattern.permute.xlu2 %v149_v3  ;;  %v65_v33 = vld [vmem:[%s226_s2] sm:$0xff]  ;;  %v66_v34 = vld [vmem:[%s226_s2 + $0x8] sm:$0xff]  ;;  %v71_v41 = vld [vmem:[%s227_s3 + $0x10] sm:$0xff] }
   0x4   :  { %49 = vperm.xlu2 %141, %v19_v1   ;;  %v69_v35 = vld [vmem:[%s227_s3] sm:$0xff]  ;;  %v70_v36 = vld [vmem:[%s227_s3 + $0x8] sm:$0xff]  ;;  %v72_v42 = vld [vmem:[%s227_s3 + $0x18] sm:$0xff] }
   0xa   :  { %138 = vset.pattern.permute.xlu0 %v150_v4  ;;  %140 = vset.pattern.permute.xlu1 %v151_v5 }
   0xb   :  { %29 = vperm.xlu0 %138, %v19_v1   ;;  %42 = vperm.xlu1 %140, %v19_v1  }
   0xc   :  { %142 = vset.pattern.permute.xlu2 %v152_v6 }
   0xd   :  { %56 = vperm.xlu2 %142, %v19_v1  }
  0x13   :  { %143 = vset.pattern.permute.xlu1 %v153_v7  ;;  %144 = vset.pattern.permute.xlu0 %v153_v7 }
  0x14   :  { %61 = vperm.xlu1 %143, %v19_v1  }
  0x5e   :  { %v50_v17 = vpop.permute.xlu2 %49 }
  0x67   :  { %v57_v26 = vpop.permute.xlu2 %56 }
  0x74   :  { %v24_v8 = vpop.permute.xlu0 %23  ;;  %v36_v10 = vpop.permute.xlu1 %35 }
  0x75   :  { %v26_v12 = vsub.f32 %v145_v9, %v24_v8 }
  0x77   :  { %v33_v15 = vmul.f32 %v26_v12, %v26_v12 }
  0x79   :  { %v38_v21 = vmul.f32 %v36_v10, %v33_v15 }
  0x7d   :  { %v30_v13 = vpop.permute.xlu0 %29  ;;  %v43_v18 = vpop.permute.xlu1 %42 }
  0x7e   :  { %v32_v14 = vsub.f32 %v146_v11, %v30_v13 }
  0x80   :  { %v39_v16 = vmul.f32 %v32_v14, %v26_v12  ;;  %v47_v19 = vmul.f32 %v32_v14, %v32_v14 }
  0x82   :  { %v40_v20 = vmul.f32 2.0, %v39_v16  ;;  %v52_v23 = vmul.f32 %v50_v17, %v47_v19 }
  0x84   :  { %v45_v22 = vmul.f32 %v43_v18, %v40_v20 }
  0x86   :  { %v46_v24 = vadd.f32 %v45_v22, %v38_v21  ;;  %v62_v28 = vpop.permute.xlu1 %61 }
  0x88   :  { %v53_v25 = vadd.f32 %v52_v23, %v46_v24 }
  0x8a   :  { %v54_v27 = vmul.f32 0.5, %v53_v25 }
  0x8c   :  { %v59_v29 = vsub.f32 %v57_v26, %v54_v27 }
  0x8e   :  { %v64_v30 = vmul.f32 %v62_v28, %v59_v29 }
  0x90   :  { %101 = vmatpush.msra.mxu0 %v64_v30  ;;  %127 = vmatpush.msra.mxu1 %v64_v30 }
  0x91   :  { %128 = vmatpush.msra.mxu2 %v64_v30  ;;  %129 = vmatpush.msra.mxu3 %v64_v30 }
  0x92   :  { %125 = vmatmul.msk.f32.vlgmr.msra.gmra.mxu2 %vm73_vm0, %v67_v31  ;;  %126 = vmatmul.msk.f32.vlgmr.msra.gmra.mxu3 %vm73_vm0, %v68_v32 }
  0x93   :  { %123 = vmatmul.msk.f32.vlgmr.msra.gmra.mxu0 %vm73_vm0, %v65_v33  ;;  %124 = vmatmul.msk.f32.vlgmr.msra.gmra.mxu1 %vm73_vm0, %v66_v34 }
 0x110   :  { %v103_v37 = vpop.f32.mrf.mxu0  ;;  %v106_v38 = vpop.f32.mrf.mxu1 }
 0x111   :  { %v104_v39 = vadd.f32 %v103_v37, %v69_v35  ;;  %v107_v40 = vadd.f32 %v106_v38, %v70_v36 }
 0x113   :  { %115 = vst [vmem:[%s228_s4] sm:$0xff] %v104_v39 }
 0x114   :  { %116 = vst [vmem:[%s228_s4 + $0x8] sm:$0xff] %v107_v40 }
 0x115   :  { %v109_v43 = vpop.f32.mrf.mxu2  ;;  %v112_v44 = vpop.f32.mrf.mxu3 }
 0x116   :  { %v110_v45 = vadd.f32 %v109_v43, %v71_v41  ;;  %v113_v46 = vadd.f32 %v112_v44, %v72_v42 }
 0x118   :  { %117 = vst [vmem:[%s228_s4 + $0x10] sm:$0xff] %v110_v45 }
 0x119   :  { %118 = vst [vmem:[%s228_s4 + $0x18] sm:$0xff] %v113_v46 }

</bundles_post_ra>
